<compile_context>
chip_gen: v6e
topology: v6e:2x2x1
jax: 0.10.0
libtpu: 0.0.40
codegen_flags: <defaults>
</compile_context>

<pallas_src>
import numpy as np

import jax
import jax.numpy as jnp
from jax import lax
from jax.experimental import pallas as pl
from jax.experimental.pallas import tpu as pltpu

# --------------------------------------------------------------------------- #
# Geometry (channel-major flat canvases; zero border == conv padding)
# --------------------------------------------------------------------------- #
IMG = 16                    # content / style / input spatial size (16x16)
POOL_IMG = IMG // 2         # 8 after the 2x2 average pool
C_IN, C1, C2, C3 = 3, 8, 8, 16
CP = 8                      # channel padding (conv_1 Cin 3 -> 8)

WA = 19                     # canvas width for the conv_1 / conv_2 stages
L_A = 384                   # conv_1 input flat buffer (20x19 canvas + slack)
N_B = 344                   # conv_1 output flat length (conv_2 input canvas)
N_C = 304                   # conv_2 output flat length (16 rows x 19 cols)
WD = 10                     # canvas width for the conv_3 stage
L_D = 128                   # conv_3 input flat buffer (10x10 canvas + slack)
N_E = 80                    # conv_3 output flat length (8 rows x 10 cols)

# const-slab (16, 512) layout
M_COL = 160                 # masks m1/m2/m3 live at rows 0/1/2, cols [160, ...)
WSLAB_W = 512
# target-slab (16, 320) layout: ct2 rows[0:8) cols[0:304); sg1 rows[8:16)
# cols[0:8); sg2 rows[8:16) cols[8:16); sg3 rows[0:16) cols[304:320)
TSLAB_W = 320

IMAGENET_MEAN = np.array([0.485, 0.456, 0.406], np.float32)
IMAGENET_STD = np.array([0.229, 0.224, 0.225], np.float32)
_NSCALE = jnp.asarray((1.0 / IMAGENET_STD).reshape(3, 1, 1))
_NSHIFT = jnp.asarray((-IMAGENET_MEAN / IMAGENET_STD).reshape(3, 1, 1))


# --------------------------------------------------------------------------- #
# In-kernel helpers (operate on VMEM-resident channel-major values)
# --------------------------------------------------------------------------- #
def _conv3x3(x_flat, w_packed, bias, width, n_out):
    """3x3 / stride-1 conv over a zero-ringed flat canvas, as ONE matmul.

    x_flat   : (8, L) channel-major flat canvas of row width `width`, whose
               border ring is already zero.
    w_packed : (Cout, 72) packed weights, row index t*8+ci with t = kh*3+kw.
    Returns (Cout, n_out) f32; output flat q maps to canvas (q//width, q%width)
    and equals the conv centered at input canvas (q//width + 1, q%width + 1).
    """
    offs = [kh * width + kw for kh in range(3) for kw in range(3)]
    patches = jnp.concatenate([x_flat[:, o:o + n_out] for o in offs], axis=0)
    return jnp.dot(w_packed, patches, preferred_element_type=jnp.float32) + bias


def _gram(f, inv_factor):
    """torch get_gram_matrix for channel-major features f=(C, Npix)."""
    g = lax.dot_general(f, f, (((1,), (1,)), ((), ())),
                        preferred_element_type=jnp.float32)
    return g * inv_factor


def _mse(a, b, inv_size):
    d = a - b
    return jnp.sum(d * d, keepdims=True) * inv_size           # (1, 1)


# --------------------------------------------------------------------------- #
# Fused kernel: truncated model + all losses
# --------------------------------------------------------------------------- #
def _nst_kernel(x0_ref, w_ref, pool_ref, t_ref,
                f3_ref, f2_ref, gram_ref, loss_ref):
    # Unpack the packed constant slab (static sub-tile loads, one DMA'd input).
    w1 = w_ref[0:8, 0:72]
    w2 = w_ref[8:16, 0:72]
    w3 = w_ref[0:16, 72:144]
    b1 = w_ref[0:8, 144:145]
    b2 = w_ref[8:16, 144:145]
    b3 = w_ref[0:16, 145:146]
    m1 = w_ref[0:1, M_COL:M_COL + N_B]
    m2 = w_ref[1:2, M_COL:M_COL + N_C]
    m3 = w_ref[2:3, M_COL:M_COL + N_E]

    # conv_1 (3->8); mask restores the exact-zero ring / junk cols; gram_1 is
    # taken pre-relu (style_loss_1 sits between conv_1 and relu_1 in torch).
    x0 = x0_ref[...]                                            # (8, 384)
    f1 = _conv3x3(x0, w1, b1, WA, N_B) * m1                     # (8, 344)
    g1 = _gram(f1, 1.0 / (C1 * IMG * IMG))
    h1 = jnp.maximum(f1, 0.0)                                   # relu_1

    # conv_2 (8->8); content target / gram_2 are pre-relu.
    f2 = _conv3x3(h1, w2, b2, WA, N_C) * m2                     # (8, 304)
    f2_ref[...] = f2
    g2 = _gram(f2, 1.0 / (C2 * IMG * IMG))
    h2 = jnp.maximum(f2, 0.0)                                   # relu_2

    # avgpool_2 (2x2, stride 2) as one MXU matmul that drops the pooled image
    # straight onto conv_3's zero-ringed flat canvas (ring built into P).
    pool = pool_ref[...].astype(jnp.float32)                    # bf16 -> f32
    d = jnp.dot(h2, pool, preferred_element_type=jnp.float32)   # (8, 128)

    # conv_3 (8->16): its masked output is the truncated model's output.
    f3 = _conv3x3(d, w3, b3, WD, N_E) * m3                      # (16, 80)
    f3_ref[...] = f3
    g3 = _gram(f3, 1.0 / (C3 * POOL_IMG * POOL_IMG))

    # Targets (packed slab); ContentLoss/StyleLoss are pass-through in torch,
    # their losses are explicit packed outputs here.
    ct2 = t_ref[0:8, 0:N_C]
    sg1 = t_ref[8:16, 0:8]
    sg2 = t_ref[8:16, 8:16]
    sg3 = t_ref[0:16, 304:320]

    loss_ref[...] = jnp.concatenate([
        _mse(sg1, g1, 1.0 / (C1 * C1)),
        _mse(ct2, f2, 1.0 / (C2 * IMG * IMG)),
        _mse(sg2, g2, 1.0 / (C2 * C2)),
        _mse(sg3, g3, 1.0 / (C3 * C3)),
    ], axis=1)                                                  # (1, 4)

    g12 = jnp.concatenate([g1, g2], axis=1)                     # (8, 16)
    g12 = jnp.concatenate([g12, jnp.zeros((8, 16), jnp.float32)], axis=0)
    gram_ref[...] = jnp.concatenate([g12, g3], axis=1)          # (16, 32)


def _build_fused_call():
    vmem = pl.BlockSpec(memory_space=pltpu.MemorySpace.VMEM)
    out_shape = (
        jax.ShapeDtypeStruct((C3, N_E), jnp.float32),   # f3 (channel-major)
        jax.ShapeDtypeStruct((C2, N_C), jnp.float32),   # f2 (channel-major)
        jax.ShapeDtypeStruct((16, 32), jnp.float32),    # packed grams g1|g2|g3
        jax.ShapeDtypeStruct((1, 4), jnp.float32),      # packed losses
    )
    return pl.pallas_call(
        _nst_kernel,
        out_shape=out_shape,
        in_specs=[vmem, vmem, vmem, vmem],
        out_specs=(vmem, vmem, vmem, vmem),
    )


_FUSED_CALL = _build_fused_call()


# --------------------------------------------------------------------------- #
# Host-side glue
# --------------------------------------------------------------------------- #
def init_params(key):
    """Deterministic stand-in weights for the truncated VGG-style stack."""
    def conv_init(k, cin, cout):
        kw, kb = jax.random.split(k)
        w = jax.random.normal(kw, (3, 3, cin, cout), jnp.float32) / jnp.sqrt(9.0 * cin)
        b = jax.random.normal(kb, (cout,), jnp.float32) * 0.01
        return w, b

    k1, k2, k3 = jax.random.split(key, 3)
    w1, b1 = conv_init(k1, C_IN, C1)
    w2, b2 = conv_init(k2, C1, C2)
    w3, b3 = conv_init(k3, C2, C3)
    return {"w1": w1, "b1": b1, "w2": w2, "b2": b2, "w3": w3, "b3": b3}


def _pack_w(w):
    """(3,3,Cin,Cout) -> (Cout, 72) with row index t*8+ci, Cin zero-padded to 8."""
    cin, cout = w.shape[2], w.shape[3]
    wt = jnp.transpose(w, (3, 0, 1, 2)).reshape(cout, 9, cin)
    if cin < CP:
        wt = jnp.pad(wt, ((0, 0), (0, 0), (0, CP - cin)))
    return wt.reshape(cout, 9 * CP)


def _build_constants(params):
    """One packed constant slab + bf16 pool matrix (built once)."""
    # Ring / junk-column masks for the three conv-output flat canvases.
    m1 = np.zeros((1, N_B), np.float32)
    for i in range(IMG):
        for j in range(IMG):
            m1[0, (1 + i) * WA + (1 + j)] = 1.0
    m2 = np.zeros((1, N_C), np.float32)
    for i in range(IMG):
        for j in range(IMG):
            m2[0, i * WA + j] = 1.0
    m3 = np.zeros((1, N_E), np.float32)
    for i in range(POOL_IMG):
        for j in range(POOL_IMG):
            m3[0, i * WD + j] = 1.0

    wslab = jnp.zeros((16, WSLAB_W), jnp.float32)
    wslab = wslab.at[0:8, 0:72].set(_pack_w(params["w1"]))
    wslab = wslab.at[8:16, 0:72].set(_pack_w(params["w2"]))
    wslab = wslab.at[0:16, 72:144].set(_pack_w(params["w3"]))
    wslab = wslab.at[0:8, 144:145].set(params["b1"].reshape(C1, 1))
    wslab = wslab.at[8:16, 144:145].set(params["b2"].reshape(C2, 1))
    wslab = wslab.at[0:16, 145:146].set(params["b3"].reshape(C3, 1))
    wslab = wslab.at[0:1, M_COL:M_COL + N_B].set(jnp.asarray(m1))
    wslab = wslab.at[1:2, M_COL:M_COL + N_C].set(jnp.asarray(m2))
    wslab = wslab.at[2:3, M_COL:M_COL + N_E].set(jnp.asarray(m3))

    # 2x2 average pool as a (304, 128) matrix: source = conv_2 output flat
    # positions, destination = conv_3 input canvas flat positions (the all-zero
    # destination columns create conv_3's zero padding ring for free).
    pool = np.zeros((N_C, L_D), np.float32)
    for i in range(POOL_IMG):
        for j in range(POOL_IMG):
            dst = (1 + i) * WD + (1 + j)
            for di in range(2):
                for dj in range(2):
                    src = (2 * i + di) * WA + (2 * j + dj)
                    pool[src, dst] = 0.25
    pool = jnp.asarray(pool, dtype=jnp.bfloat16)   # 0 / 0.25 exact in bf16

    return {"wslab": wslab, "pool": pool}


def _build_x0(x_nchw):
    """NCHW (1,3,16,16) -> normalized channel-major conv_1 input canvas."""
    img = x_nchw[0].astype(jnp.float32)                       # (3, 16, 16)
    img = img * _NSCALE + _NSHIFT                             # Normalize (folded)
    canvas = jnp.zeros((CP, 20, WA), jnp.float32)
    canvas = canvas.at[0:C_IN, 2:2 + IMG, 2:2 + IMG].set(img)  # zero ring kept
    flat = canvas.reshape(CP, 20 * WA)
    return jnp.pad(flat, ((0, 0), (0, L_A - 20 * WA)))


def _forward(x_nchw, wslab, pool, tslab):
    """One fused pallas_call -> (output NCHW, losses, f2, packed grams)."""
    x0 = _build_x0(x_nchw)
    f3, f2, grams, losses = _FUSED_CALL(x0, wslab, pool, tslab)
    out_nchw = f3.reshape(C3, POOL_IMG, WD)[:, :, 0:POOL_IMG].reshape(
        1, C3, POOL_IMG, POOL_IMG)
    loss_dict = {
        "style_loss_1": losses[0, 0],
        "content_loss_2": losses[0, 1],
        "style_loss_2": losses[0, 2],
        "style_loss_3": losses[0, 3],
    }
    return out_nchw, loss_dict, f2, grams


_forward_jit = jax.jit(_forward)


class NeuralStyleTransferPallas:
    """JAX/Pallas equivalent of NeuralStyleTransfer, truncated at style_loss_3."""

    def __init__(self, content_img, style_img, params):
        assert content_img.ndim == 4, "Content image tensor must be 4-dimensional"
        assert style_img.ndim == 4, "Style image tensor must be 4-dimensional"
        assert content_img.shape[0] == 1 and style_img.shape[0] == 1, "Batch size must be 1"
        consts = _build_constants(params)
        self._wslab = consts["wslab"]
        self._pool = consts["pool"]

        # Targets captured at construction (detached in torch; constants here),
        # using the SAME fused kernel / compiled executable with zero targets.
        zero_t = jnp.zeros((16, TSLAB_W), jnp.float32)
        _, _, f2_c, _ = _forward_jit(content_img, self._wslab, self._pool, zero_t)
        _, _, _, gr_s = _forward_jit(style_img, self._wslab, self._pool, zero_t)
        tslab = jnp.zeros((16, TSLAB_W), jnp.float32)
        tslab = tslab.at[0:8, 0:N_C].set(f2_c)
        tslab = tslab.at[8:16, 0:8].set(gr_s[0:8, 0:8])
        tslab = tslab.at[8:16, 8:16].set(gr_s[0:8, 8:16])
        tslab = tslab.at[0:16, 304:320].set(gr_s[0:16, 16:32])
        self._tslab = tslab

    def forward(self, x_nchw):
        out, losses, *_ = _forward_jit(x_nchw, self._wslab, self._pool, self._tslab)
        return out, losses


if __name__ == "__main__":
    key = jax.random.PRNGKey(0)
    kp, kc, ks, kx = jax.random.split(key, 4)
    params = init_params(kp)

    content_img = jax.random.uniform(kc, (1, 3, 16, 16), jnp.float32)
    style_img = jax.random.uniform(ks, (1, 3, 16, 16), jnp.float32)
    x = jax.random.uniform(kx, (1, 3, 16, 16), jnp.float32)

    nst = NeuralStyleTransferPallas(content_img, style_img, params)
    out, losses = nst.forward(x)
    jax.block_until_ready(out)
    jax.block_until_ready(losses)
    assert out.shape == (1, 16, 8, 8)

    # Sanity: feeding the content image back must give (near-)zero content loss.
    _, losses_c = nst.forward(content_img)
    assert float(losses_c["content_loss_2"]) < 1e-6

    print("KERNEL_OK")
</pallas_src>

<mosaic_0001>
module attributes {stable_mosaic.version = 11 : i64} {
  func.func @_nst_kernel(%arg0: memref<8x384xf32, #tpu.memory_space<vmem>>, %arg1: memref<16x512xf32, #tpu.memory_space<vmem>>, %arg2: memref<304x128xbf16, #tpu.memory_space<vmem>>, %arg3: memref<16x320xf32, #tpu.memory_space<vmem>>, %arg4: memref<16x80xf32, #tpu.memory_space<vmem>>, %arg5: memref<8x304xf32, #tpu.memory_space<vmem>>, %arg6: memref<16x32xf32, #tpu.memory_space<vmem>>, %arg7: memref<1x4xf32, #tpu.memory_space<vmem>>) attributes {dimension_semantics = [], scalar_prefetch = 0 : i64, scratch_operands = 0 : i64, tpu.core_type = #tpu.core_type<tc>} {
    %c0 = arith.constant 0 : index
    %c0_0 = arith.constant 0 : index
    %0 = vector.load %arg1[%c0, %c0_0] : memref<16x512xf32, #tpu.memory_space<vmem>>, vector<8x72xf32>
    %c8 = arith.constant 8 : index
    %c0_1 = arith.constant 0 : index
    %1 = vector.load %arg1[%c8, %c0_1] : memref<16x512xf32, #tpu.memory_space<vmem>>, vector<8x72xf32>
    %c0_2 = arith.constant 0 : index
    %c72 = arith.constant 72 : index
    %2 = vector.load %arg1[%c0_2, %c72] : memref<16x512xf32, #tpu.memory_space<vmem>>, vector<16x72xf32>
    %c0_3 = arith.constant 0 : index
    %c144 = arith.constant 144 : index
    %3 = vector.load %arg1[%c0_3, %c144] : memref<16x512xf32, #tpu.memory_space<vmem>>, vector<8x1xf32>
    %c8_4 = arith.constant 8 : index
    %c144_5 = arith.constant 144 : index
    %4 = vector.load %arg1[%c8_4, %c144_5] : memref<16x512xf32, #tpu.memory_space<vmem>>, vector<8x1xf32>
    %c0_6 = arith.constant 0 : index
    %c145 = arith.constant 145 : index
    %5 = vector.load %arg1[%c0_6, %c145] : memref<16x512xf32, #tpu.memory_space<vmem>>, vector<16x1xf32>
    %c0_7 = arith.constant 0 : index
    %c160 = arith.constant 160 : index
    %6 = vector.load %arg1[%c0_7, %c160] : memref<16x512xf32, #tpu.memory_space<vmem>>, vector<1x344xf32>
    %c1 = arith.constant 1 : index
    %c160_8 = arith.constant 160 : index
    %7 = vector.load %arg1[%c1, %c160_8] : memref<16x512xf32, #tpu.memory_space<vmem>>, vector<1x304xf32>
    %c2 = arith.constant 2 : index
    %c160_9 = arith.constant 160 : index
    %8 = vector.load %arg1[%c2, %c160_9] : memref<16x512xf32, #tpu.memory_space<vmem>>, vector<1x80xf32>
    %c0_10 = arith.constant 0 : index
    %c0_11 = arith.constant 0 : index
    %9 = vector.load %arg0[%c0_10, %c0_11] : memref<8x384xf32, #tpu.memory_space<vmem>>, vector<8x384xf32>
    %10 = vector.extract_strided_slice %9 {offsets = [0, 0], sizes = [8, 344], strides = [1, 1]} : vector<8x384xf32> to vector<8x344xf32>
    %11 = vector.extract_strided_slice %9 {offsets = [0, 1], sizes = [8, 344], strides = [1, 1]} : vector<8x384xf32> to vector<8x344xf32>
    %12 = vector.extract_strided_slice %9 {offsets = [0, 2], sizes = [8, 344], strides = [1, 1]} : vector<8x384xf32> to vector<8x344xf32>
    %13 = vector.extract_strided_slice %9 {offsets = [0, 19], sizes = [8, 344], strides = [1, 1]} : vector<8x384xf32> to vector<8x344xf32>
    %14 = vector.extract_strided_slice %9 {offsets = [0, 20], sizes = [8, 344], strides = [1, 1]} : vector<8x384xf32> to vector<8x344xf32>
    %15 = vector.extract_strided_slice %9 {offsets = [0, 21], sizes = [8, 344], strides = [1, 1]} : vector<8x384xf32> to vector<8x344xf32>
    %16 = vector.extract_strided_slice %9 {offsets = [0, 38], sizes = [8, 344], strides = [1, 1]} : vector<8x384xf32> to vector<8x344xf32>
    %17 = vector.extract_strided_slice %9 {offsets = [0, 39], sizes = [8, 344], strides = [1, 1]} : vector<8x384xf32> to vector<8x344xf32>
    %18 = vector.extract_strided_slice %9 {offsets = [0, 40], sizes = [8, 344], strides = [1, 1]} : vector<8x384xf32> to vector<8x344xf32>
    %19 = tpu.concatenate %10, %11, %12, %13, %14, %15, %16, %17, %18 in 0 : vector<8x344xf32>, vector<8x344xf32>, vector<8x344xf32>, vector<8x344xf32>, vector<8x344xf32>, vector<8x344xf32>, vector<8x344xf32>, vector<8x344xf32>, vector<8x344xf32> -> vector<72x344xf32>
    %cst = arith.constant dense<0.000000e+00> : vector<8x344xf32>
    %20 = tpu.matmul %0, %19, %cst {dimension_numbers = #tpu.dot_dimension_numbers<[1], [0], [0], [1], [0, 0, 1, 1], [], []>} : vector<8x72xf32>, vector<72x344xf32>, vector<8x344xf32> -> vector<8x344xf32>
    %21 = vector.broadcast %3 : vector<8x1xf32> to vector<8x344xf32>
    %22 = arith.addf %20, %21 : vector<8x344xf32>
    %23 = vector.broadcast %6 : vector<1x344xf32> to vector<8x344xf32>
    %24 = arith.mulf %22, %23 : vector<8x344xf32>
    %cst_12 = arith.constant dense<0.000000e+00> : vector<8x8xf32>
    %25 = tpu.matmul %24, %24, %cst_12 {dimension_numbers = #tpu.dot_dimension_numbers<[1], [1], [0], [0], [0, 0, 1, 0], [], []>} : vector<8x344xf32>, vector<8x344xf32>, vector<8x8xf32> -> vector<8x8xf32>
    %cst_13 = arith.constant 4.8828125E-4 : f32
    %26 = vector.broadcast %cst_13 : f32 to vector<8x8xf32>
    %27 = arith.mulf %25, %26 : vector<8x8xf32>
    %cst_14 = arith.constant 0.000000e+00 : f32
    %28 = vector.broadcast %cst_14 : f32 to vector<8x344xf32>
    %29 = arith.maximumf %24, %28 : vector<8x344xf32>
    %30 = vector.extract_strided_slice %29 {offsets = [0, 0], sizes = [8, 304], strides = [1, 1]} : vector<8x344xf32> to vector<8x304xf32>
    %31 = vector.extract_strided_slice %29 {offsets = [0, 1], sizes = [8, 304], strides = [1, 1]} : vector<8x344xf32> to vector<8x304xf32>
    %32 = vector.extract_strided_slice %29 {offsets = [0, 2], sizes = [8, 304], strides = [1, 1]} : vector<8x344xf32> to vector<8x304xf32>
    %33 = vector.extract_strided_slice %29 {offsets = [0, 19], sizes = [8, 304], strides = [1, 1]} : vector<8x344xf32> to vector<8x304xf32>
    %34 = vector.extract_strided_slice %29 {offsets = [0, 20], sizes = [8, 304], strides = [1, 1]} : vector<8x344xf32> to vector<8x304xf32>
    %35 = vector.extract_strided_slice %29 {offsets = [0, 21], sizes = [8, 304], strides = [1, 1]} : vector<8x344xf32> to vector<8x304xf32>
    %36 = vector.extract_strided_slice %29 {offsets = [0, 38], sizes = [8, 304], strides = [1, 1]} : vector<8x344xf32> to vector<8x304xf32>
    %37 = vector.extract_strided_slice %29 {offsets = [0, 39], sizes = [8, 304], strides = [1, 1]} : vector<8x344xf32> to vector<8x304xf32>
    %38 = vector.extract_strided_slice %29 {offsets = [0, 40], sizes = [8, 304], strides = [1, 1]} : vector<8x344xf32> to vector<8x304xf32>
    %39 = tpu.concatenate %30, %31, %32, %33, %34, %35, %36, %37, %38 in 0 : vector<8x304xf32>, vector<8x304xf32>, vector<8x304xf32>, vector<8x304xf32>, vector<8x304xf32>, vector<8x304xf32>, vector<8x304xf32>, vector<8x304xf32>, vector<8x304xf32> -> vector<72x304xf32>
    %cst_15 = arith.constant dense<0.000000e+00> : vector<8x304xf32>
    %40 = tpu.matmul %1, %39, %cst_15 {dimension_numbers = #tpu.dot_dimension_numbers<[1], [0], [0], [1], [0, 0, 1, 1], [], []>} : vector<8x72xf32>, vector<72x304xf32>, vector<8x304xf32> -> vector<8x304xf32>
    %41 = vector.broadcast %4 : vector<8x1xf32> to vector<8x304xf32>
    %42 = arith.addf %40, %41 : vector<8x304xf32>
    %43 = vector.broadcast %7 : vector<1x304xf32> to vector<8x304xf32>
    %44 = arith.mulf %42, %43 : vector<8x304xf32>
    %c0_16 = arith.constant 0 : index
    %c0_17 = arith.constant 0 : index
    %45 = vector.load %arg5[%c0_16, %c0_17] : memref<8x304xf32, #tpu.memory_space<vmem>>, vector<8x304xf32>
    tpu.vector_store %arg5[%c0_16, %c0_17], %44 {strides = array<i32>} : memref<8x304xf32, #tpu.memory_space<vmem>>, vector<8x304xf32>,
    %cst_18 = arith.constant dense<0.000000e+00> : vector<8x8xf32>
    %46 = tpu.matmul %44, %44, %cst_18 {dimension_numbers = #tpu.dot_dimension_numbers<[1], [1], [0], [0], [0, 0, 1, 0], [], []>} : vector<8x304xf32>, vector<8x304xf32>, vector<8x8xf32> -> vector<8x8xf32>
    %cst_19 = arith.constant 4.8828125E-4 : f32
    %47 = vector.broadcast %cst_19 : f32 to vector<8x8xf32>
    %48 = arith.mulf %46, %47 : vector<8x8xf32>
    %cst_20 = arith.constant 0.000000e+00 : f32
    %49 = vector.broadcast %cst_20 : f32 to vector<8x304xf32>
    %50 = arith.maximumf %44, %49 : vector<8x304xf32>
    %c0_21 = arith.constant 0 : index
    %c0_22 = arith.constant 0 : index
    %51 = vector.load %arg2[%c0_21, %c0_22] : memref<304x128xbf16, #tpu.memory_space<vmem>>, vector<304x128xbf16>
    %52 = arith.extf %51 : vector<304x128xbf16> to vector<304x128xf32>
    %cst_23 = arith.constant dense<0.000000e+00> : vector<8x128xf32>
    %53 = tpu.matmul %50, %52, %cst_23 {dimension_numbers = #tpu.dot_dimension_numbers<[1], [0], [0], [1], [0, 0, 1, 1], [], []>} : vector<8x304xf32>, vector<304x128xf32>, vector<8x128xf32> -> vector<8x128xf32>
    %54 = vector.extract_strided_slice %53 {offsets = [0, 0], sizes = [8, 80], strides = [1, 1]} : vector<8x128xf32> to vector<8x80xf32>
    %55 = vector.extract_strided_slice %53 {offsets = [0, 1], sizes = [8, 80], strides = [1, 1]} : vector<8x128xf32> to vector<8x80xf32>
    %56 = vector.extract_strided_slice %53 {offsets = [0, 2], sizes = [8, 80], strides = [1, 1]} : vector<8x128xf32> to vector<8x80xf32>
    %57 = vector.extract_strided_slice %53 {offsets = [0, 10], sizes = [8, 80], strides = [1, 1]} : vector<8x128xf32> to vector<8x80xf32>
    %58 = vector.extract_strided_slice %53 {offsets = [0, 11], sizes = [8, 80], strides = [1, 1]} : vector<8x128xf32> to vector<8x80xf32>
    %59 = vector.extract_strided_slice %53 {offsets = [0, 12], sizes = [8, 80], strides = [1, 1]} : vector<8x128xf32> to vector<8x80xf32>
    %60 = vector.extract_strided_slice %53 {offsets = [0, 20], sizes = [8, 80], strides = [1, 1]} : vector<8x128xf32> to vector<8x80xf32>
    %61 = vector.extract_strided_slice %53 {offsets = [0, 21], sizes = [8, 80], strides = [1, 1]} : vector<8x128xf32> to vector<8x80xf32>
    %62 = vector.extract_strided_slice %53 {offsets = [0, 22], sizes = [8, 80], strides = [1, 1]} : vector<8x128xf32> to vector<8x80xf32>
    %63 = tpu.concatenate %54, %55, %56, %57, %58, %59, %60, %61, %62 in 0 : vector<8x80xf32>, vector<8x80xf32>, vector<8x80xf32>, vector<8x80xf32>, vector<8x80xf32>, vector<8x80xf32>, vector<8x80xf32>, vector<8x80xf32>, vector<8x80xf32> -> vector<72x80xf32>
    %cst_24 = arith.constant dense<0.000000e+00> : vector<16x80xf32>
    %64 = tpu.matmul %2, %63, %cst_24 {dimension_numbers = #tpu.dot_dimension_numbers<[1], [0], [0], [1], [0, 0, 1, 1], [], []>} : vector<16x72xf32>, vector<72x80xf32>, vector<16x80xf32> -> vector<16x80xf32>
    %65 = vector.broadcast %5 : vector<16x1xf32> to vector<16x80xf32>
    %66 = arith.addf %64, %65 : vector<16x80xf32>
    %67 = vector.broadcast %8 : vector<1x80xf32> to vector<16x80xf32>
    %68 = arith.mulf %66, %67 : vector<16x80xf32>
    %c0_25 = arith.constant 0 : index
    %c0_26 = arith.constant 0 : index
    %69 = vector.load %arg4[%c0_25, %c0_26] : memref<16x80xf32, #tpu.memory_space<vmem>>, vector<16x80xf32>
    tpu.vector_store %arg4[%c0_25, %c0_26], %68 {strides = array<i32>} : memref<16x80xf32, #tpu.memory_space<vmem>>, vector<16x80xf32>,
    %cst_27 = arith.constant dense<0.000000e+00> : vector<16x16xf32>
    %70 = tpu.matmul %68, %68, %cst_27 {dimension_numbers = #tpu.dot_dimension_numbers<[1], [1], [0], [0], [0, 0, 1, 0], [], []>} : vector<16x80xf32>, vector<16x80xf32>, vector<16x16xf32> -> vector<16x16xf32>
    %cst_28 = arith.constant 9.765625E-4 : f32
    %71 = vector.broadcast %cst_28 : f32 to vector<16x16xf32>
    %72 = arith.mulf %70, %71 : vector<16x16xf32>
    %c0_29 = arith.constant 0 : index
    %c0_30 = arith.constant 0 : index
    %73 = vector.load %arg3[%c0_29, %c0_30] : memref<16x320xf32, #tpu.memory_space<vmem>>, vector<8x304xf32>
    %c8_31 = arith.constant 8 : index
    %c0_32 = arith.constant 0 : index
    %74 = vector.load %arg3[%c8_31, %c0_32] : memref<16x320xf32, #tpu.memory_space<vmem>>, vector<8x8xf32>
    %c8_33 = arith.constant 8 : index
    %c8_34 = arith.constant 8 : index
    %75 = vector.load %arg3[%c8_33, %c8_34] : memref<16x320xf32, #tpu.memory_space<vmem>>, vector<8x8xf32>
    %c0_35 = arith.constant 0 : index
    %c304 = arith.constant 304 : index
    %76 = vector.load %arg3[%c0_35, %c304] : memref<16x320xf32, #tpu.memory_space<vmem>>, vector<16x16xf32>
    %77 = arith.subf %74, %27 : vector<8x8xf32>
    %78 = arith.mulf %77, %77 : vector<8x8xf32>
    %79 = vector.shape_cast %78 : vector<8x8xf32> to vector<1x8x8xf32>
    %cst_36 = arith.constant dense<0.000000e+00> : vector<1xf32>
    %80 = vector.multi_reduction <add>, %79, %cst_36 [1, 2] : vector<1x8x8xf32> to vector<1xf32>
    %81 = vector.shape_cast %80 : vector<1xf32> to vector<1x1x1xf32>
    %82 = vector.extract %81[0, 0, 0] : f32 from vector<1x1x1xf32>
    %83 = vector.broadcast %82 : f32 to vector<1x1xf32>
    %cst_37 = arith.constant 1.562500e-02 : f32
    %84 = vector.broadcast %cst_37 : f32 to vector<1x1xf32>
    %85 = arith.mulf %83, %84 : vector<1x1xf32>
    %86 = arith.subf %73, %44 : vector<8x304xf32>
    %87 = arith.mulf %86, %86 : vector<8x304xf32>
    %88 = vector.shape_cast %87 : vector<8x304xf32> to vector<1x8x304xf32>
    %cst_38 = arith.constant dense<0.000000e+00> : vector<1xf32>
    %89 = vector.multi_reduction <add>, %88, %cst_38 [1, 2] : vector<1x8x304xf32> to vector<1xf32>
    %90 = vector.shape_cast %89 : vector<1xf32> to vector<1x1x1xf32>
    %91 = vector.extract %90[0, 0, 0] : f32 from vector<1x1x1xf32>
    %92 = vector.broadcast %91 : f32 to vector<1x1xf32>
    %cst_39 = arith.constant 4.8828125E-4 : f32
    %93 = vector.broadcast %cst_39 : f32 to vector<1x1xf32>
    %94 = arith.mulf %92, %93 : vector<1x1xf32>
    %95 = arith.subf %75, %48 : vector<8x8xf32>
    %96 = arith.mulf %95, %95 : vector<8x8xf32>
    %97 = vector.shape_cast %96 : vector<8x8xf32> to vector<1x8x8xf32>
    %cst_40 = arith.constant dense<0.000000e+00> : vector<1xf32>
    %98 = vector.multi_reduction <add>, %97, %cst_40 [1, 2] : vector<1x8x8xf32> to vector<1xf32>
    %99 = vector.shape_cast %98 : vector<1xf32> to vector<1x1x1xf32>
    %100 = vector.extract %99[0, 0, 0] : f32 from vector<1x1x1xf32>
    %101 = vector.broadcast %100 : f32 to vector<1x1xf32>
    %cst_41 = arith.constant 1.562500e-02 : f32
    %102 = vector.broadcast %cst_41 : f32 to vector<1x1xf32>
    %103 = arith.mulf %101, %102 : vector<1x1xf32>
    %104 = arith.subf %76, %72 : vector<16x16xf32>
    %105 = arith.mulf %104, %104 : vector<16x16xf32>
    %106 = vector.shape_cast %105 : vector<16x16xf32> to vector<1x16x16xf32>
    %cst_42 = arith.constant dense<0.000000e+00> : vector<1xf32>
    %107 = vector.multi_reduction <add>, %106, %cst_42 [1, 2] : vector<1x16x16xf32> to vector<1xf32>
    %108 = vector.shape_cast %107 : vector<1xf32> to vector<1x1x1xf32>
    %109 = vector.extract %108[0, 0, 0] : f32 from vector<1x1x1xf32>
    %110 = vector.broadcast %109 : f32 to vector<1x1xf32>
    %cst_43 = arith.constant 3.906250e-03 : f32
    %111 = vector.broadcast %cst_43 : f32 to vector<1x1xf32>
    %112 = arith.mulf %110, %111 : vector<1x1xf32>
    %113 = tpu.concatenate %85, %94, %103, %112 in 1 : vector<1x1xf32>, vector<1x1xf32>, vector<1x1xf32>, vector<1x1xf32> -> vector<1x4xf32>
    %c0_44 = arith.constant 0 : index
    %c0_45 = arith.constant 0 : index
    %114 = vector.load %arg7[%c0_44, %c0_45] : memref<1x4xf32, #tpu.memory_space<vmem>>, vector<1x4xf32>
    tpu.vector_store %arg7[%c0_44, %c0_45], %113 {strides = array<i32>} : memref<1x4xf32, #tpu.memory_space<vmem>>, vector<1x4xf32>,
    %115 = tpu.concatenate %27, %48 in 1 : vector<8x8xf32>, vector<8x8xf32> -> vector<8x16xf32>
    %cst_46 = arith.constant 0.000000e+00 : f32
    %116 = vector.broadcast %cst_46 : f32 to vector<8x16xf32>
    %117 = tpu.concatenate %115, %116 in 0 : vector<8x16xf32>, vector<8x16xf32> -> vector<16x16xf32>
    %118 = tpu.concatenate %117, %72 in 1 : vector<16x16xf32>, vector<16x16xf32> -> vector<16x32xf32>
    %c0_47 = arith.constant 0 : index
    %c0_48 = arith.constant 0 : index
    %119 = vector.load %arg6[%c0_47, %c0_48] : memref<16x32xf32, #tpu.memory_space<vmem>>, vector<16x32xf32>
    tpu.vector_store %arg6[%c0_47, %c0_48], %118 {strides = array<i32>} : memref<16x32xf32, #tpu.memory_space<vmem>>, vector<16x32xf32>,
    return
  }
}

</mosaic_0001>

<bundles_post_ra>
// kernel: _forward.1
= control target key start
LH: loop header
LB: loop body
LE: loop exit
PB: predicated region body
PF: predicated region fallthrough
CT: control target
= control target key end

     0   :  { %13 = vsyncpa [#allocation3], 0  ;;  %s1835_s28 = smov 88   ;;  %v1836_v3 = vmov 0.0   ;;  %s2307_s0 = inlined_call_operand.vmem [shape: f32[8,384], index: 0, kind: input, shape index: {}]   ;;  %s2308_s1 = inlined_call_operand.vmem [shape: f32[16,512], index: 1, kind: input, shape index: {}]   ;;  %s2309_s2 = inlined_call_operand.vmem [shape: bf16[304,128], index: 2, kind: input, shape index: {}]   ;;  %s2310_s3 = inlined_call_operand.vmem [shape: f32[16,320], index: 3, kind: input, shape index: {}]   ;;  %s2311_s4 = inlined_call_operand.vmem [shape: f32[16,80], index: 4, kind: output, shape index: {0}]   ;;  %s2312_s5 = inlined_call_operand.hbm [shape: f32[8,304], index: 5, kind: output, shape index: {1}]   ;;  %s2313_s6 = inlined_call_operand.hbm [shape: f32[16,32], index: 6, kind: output, shape index: {2}]   ;;  %s2314_s7 = inlined_call_operand.vmem [shape: f32[1,4], index: 7, kind: output, shape index: {3}]  }
   0x1   :  { %v1904_v0 = vld [vmem:[%s2307_s0 + $0x8] sm:$0xff]  ;;  %v1909_v1 = vld [vmem:[%s2307_s0] sm:$0xff]  ;;  %v1918_v2 = vld [vmem:[%s2307_s0 + $0x10] sm:$0xff]  ;;  %1658 = vmatprep.subr.mxu1 %v1836_v3  ;;  %207 = vmatprep.mubr.f32.mxu0 %v1836_v3 }
   0x2   :  { %124 = vrot.lane.b32.xlu0 %v1904_v0, %s1835_s28  ;;  %122 = vrot.lane.b32.xlu1 %v1909_v1, %s1835_s28 }
   0x3   :  { %14 = vsyncpa [#allocation5], 0  ;;  %s1837_s8 = smov 89   ;;  %s1838_s0 = smov 90   ;;  %vm1842_vm0 = vmmov 0   ;;  %v285_v4 = vlaneseq  ;;  %v1844_v5 = vmov 16  }
   0x4   :  { %s1839_s9 = smov 107   ;;  %s1840_s10 = smov 108   ;;  %1676 = vmatprep.mubr.msk.f32.mxu1 %vm1842_vm0, %v1836_v3  ;;  %1787 = vset.pattern.permute.xlu0 %v1844_v5  ;;  %v1466_v8 = vld [vmem:[%s2308_s1 + $0x8] ss:$8 sm:$0x7]  ;;  %vm128_vm1 = vcmask 719872  }
   0x5   :  { %s1841_s11 = smov 109   ;;  %s1843_s12 = smov 126   ;;  %1788 = vset.pattern.permute.xlu1 %v1844_v5  ;;  %v1960_v6 = vshrl.u32 %v285_v4, 7  ;;  %v1981_v12 = vld [vmem:[%s2308_s1 + $0x8] sm:$0xff]  ;;  %vm116_vm2 = vcmask 728064   ;;  %vm104_vm3 = vcmask 736256  }
   0x6   :  { %126 = vrot.lane.b32.xlu0 %v1918_v2, %s1835_s28  ;;  %112 = vrot.lane.b32.xlu1 %v1904_v0, %s1837_s8  ;;  %s1845_s13 = smov 127   ;;  %s1846_s18 = smov 96   ;;  %vm92_vm4 = vcmask 875520   ;;  %vm80_vm5 = vcmask 883712   ;;  %vm68_vm6 = vcmask 891904   ;;  %vm56_vm7 = vcmask 1031168  }
   0x7   :  { %v291_v7 = vsub.s32 1, %v1960_v6  ;;  %v295_v10 = vsub.s32 2, %v1960_v6  ;;  %v287_v11 = vsub.s32 0, %v1960_v6  ;;  %vm44_vm8 = vcmask 1039360   ;;  %v2017_v55 = vld [vmem:[%s2308_s1] sm:$0xff]  ;;  %s1849_s14 = smov 118  }
   0x8   :  { %vm139_vm9 = vcmask 588800   ;;  %vm303_vm10 = vcmask 785408   ;;  %vm728_vm11 = vcmask 392192   ;;  %s1850_s15 = smov 117   ;;  %s1852_s16 = smov 56   ;;  %vm1137_vm12 = vcmask 457728  }
   0x9   :  { %v292_v9 = vrot.slane %v1466_v8, %v291_v7  ;;  %v296_v13 = vrot.slane %v1466_v8, %v295_v10  ;;  %v288_v14 = vrot.slane %v1466_v8, %v287_v11  ;;  %vm1225_vm13 = vcmask 654336   ;;  %s1853_s17 = smov 48   ;;  %s1854_s19 = smov 8  }
   0xa   :  { %114 = vrot.lane.b32.xlu0 %v1918_v2, %s1837_s8  ;;  %110 = vrot.lane.b32.xlu1 %v1909_v1, %s1837_s8  ;;  %s1856_s24 = smov 120   ;;  %vm1318_vm14 = vcmask 64512   ;;  %vm1393_vm15 = vcmask 130048   ;;  %s1858_s25 = smov [#allocation2]  }
   0xb   :  { %s1436_s26 = sshll.u32 %s1858_s25, 4  ;;  %s1437_s26 = int_to_ptr.vmem [resolvable:$true] %s1436_s26 }
   0xc   :  { %s1791_s27 = scalar_lea.vmem %s1437_s26, 384  ;;  %p1796_p1 = scmp.lt.s32.totalorder %s1437_s26, %s1437_s26 }
   0xd   :  { %p1792_p0 = scmp.ne.s32.totalorder %s1437_s26, %s1791_s27  ;;  %p1797_p2 = scmp.lt.s32.totalorder %s1791_s27, %s1791_s27 }
   0xe   :  { %100 = vrot.lane.b32.xlu0 %v1904_v0, %s1838_s0  ;;  %102 = vrot.lane.b32.xlu1 %v1918_v2, %s1838_s0 }
   0xf   :  { %p1798_p3 = por %p1797_p2, %p1796_p1 }
  0x11   :  { %p1799_p4 = pnand %p1798_p3, %p1792_p0 }
  0x12   :  { %98 = vrot.lane.b32.xlu0 %v1909_v1, %s1838_s0  ;;  %88 = vrot.lane.b32.xlu1 %v1904_v0, %s1839_s9 }
  0x16   :  { %90 = vrot.lane.b32.xlu0 %v1918_v2, %s1839_s9  ;;  %86 = vrot.lane.b32.xlu1 %v1909_v1, %s1839_s9 }
  0x1a   :  { %76 = vrot.lane.b32.xlu0 %v1904_v0, %s1840_s10  ;;  %78 = vrot.lane.b32.xlu1 %v1918_v2, %s1840_s10 }
  0x1e   :  { %74 = vrot.lane.b32.xlu0 %v1909_v1, %s1840_s10  ;;  %64 = vrot.lane.b32.xlu1 %v1904_v0, %s1841_s11 }
  0x22   :  { %66 = vrot.lane.b32.xlu0 %v1918_v2, %s1841_s11  ;;  %62 = vrot.lane.b32.xlu1 %v1909_v1, %s1841_s11 }
  0x26   :  { %52 = vrot.lane.b32.xlu0 %v1904_v0, %s1843_s12  ;;  %54 = vrot.lane.b32.xlu1 %v1918_v2, %s1843_s12 }
  0x2a   :  { %50 = vrot.lane.b32.xlu0 %v1909_v1, %s1843_s12  ;;  %40 = vrot.lane.b32.xlu1 %v1904_v0, %s1845_s13 }
  0x2e   :  { %42 = vrot.lane.b32.xlu0 %v1918_v2, %s1845_s13  ;;  %38 = vrot.lane.b32.xlu1 %v1909_v1, %s1845_s13 }
  0x32   :  { %136 = vperm.xlu0 %1787, %v1981_v12   ;;  %299 = vrot.lane.b32.xlu1 %v292_v9, %s1846_s18 }
  0x36   :  { %301 = vrot.lane.b32.xlu1 %v296_v13, %s1846_s18  ;;  %297 = vrot.lane.b32.xlu0 %v288_v14, %s1846_s18 }
  0x74   :  { %v125_v15 = vpop.permute.xlu0 %124  ;;  %v123_v16 = vpop.permute.xlu1 %122 }
  0x75   :  { %v129_v20 = vsel %vm128_vm1, %v123_v16, %v125_v15 }
  0x78   :  { %v127_v17 = vpop.permute.xlu0 %126  ;;  %v113_v18 = vpop.permute.xlu1 %112 }
  0x79   :  { %1659 = vmatpush3.msra.mxu1 %v127_v17  ;;  %v130_v19 = vsel %vm128_vm1, %v125_v15, %v127_v17  ;;  %v2095_v17 = vld [vmem:[%s2308_s1 + $0x28] sm:$0xff] }
  0x7a   :  { %157 = vmatprep.subr.mxu0 %v130_v19  ;;  %1660 = vmatprep.subr.mxu1 %v1836_v3 }
  0x7b   :  { %158 = vmatpush1.msra.mxu0 %v129_v20 }
  0x7c   :  { %v115_v21 = vpop.permute.xlu0 %114  ;;  %v111_v22 = vpop.permute.xlu1 %110 }
  0x7d   :  { %1661 = vmatpush3.msra.mxu1 %v115_v21  ;;  %v118_v23 = vsel %vm116_vm2, %v113_v18, %v115_v21  ;;  %v117_v24 = vsel %vm116_vm2, %v111_v22, %v113_v18  ;;  %v1467_v18 = vld [vmem:[%s2308_s1 + $0x9] ss:$8 sm:$0x7] }
  0x7e   :  { %159 = vmatprep.subr.mxu0 %v118_v23  ;;  %1662 = vmatprep.subr.mxu1 %v1836_v3  ;;  %v707_v19 = vrot.slane %v1467_v18, %v291_v7  ;;  %v711_v20 = vrot.slane %v1467_v18, %v295_v10  ;;  %v703_v21 = vrot.slane %v1467_v18, %v287_v11 }
  0x7f   :  { %160 = vmatpush1.msra.mxu0 %v117_v24 }
  0x80   :  { %v101_v25 = vpop.permute.xlu0 %100  ;;  %v103_v26 = vpop.permute.xlu1 %102 }
  0x81   :  { %v106_v27 = vsel %vm104_vm3, %v101_v25, %v103_v26  ;;  %1663 = vmatpush3.msra.mxu1 %v103_v26 }
  0x82   :  { %161 = vmatprep.subr.mxu0 %v106_v27  ;;  %1664 = vmatprep.subr.mxu1 %v1836_v3 }
  0x84   :  { %v99_v28 = vpop.permute.xlu0 %98  ;;  %v89_v29 = vpop.permute.xlu1 %88 }
  0x85   :  { %v105_v30 = vsel %vm104_vm3, %v99_v28, %v101_v25 }
  0x86   :  { %162 = vmatpush1.msra.mxu0 %v105_v30 }
  0x88   :  { %v91_v31 = vpop.permute.xlu0 %90  ;;  %v87_v32 = vpop.permute.xlu1 %86 }
  0x89   :  { %1665 = vmatpush3.msra.mxu1 %v91_v31  ;;  %v94_v33 = vsel %vm92_vm4, %v89_v29, %v91_v31  ;;  %v93_v34 = vsel %vm92_vm4, %v87_v32, %v89_v29 }
  0x8a   :  { %163 = vmatprep.subr.mxu0 %v94_v33  ;;  %1666 = vmatprep.subr.mxu1 %v1836_v3 }
  0x8b   :  { %164 = vmatpush1.msra.mxu0 %v93_v34 }
  0x8c   :  { %v77_v35 = vpop.permute.xlu0 %76  ;;  %v79_v36 = vpop.permute.xlu1 %78 }
  0x8d   :  { %v82_v37 = vsel %vm80_vm5, %v77_v35, %v79_v36  ;;  %1667 = vmatpush3.msra.mxu1 %v79_v36 }
  0x8e   :  { %165 = vmatprep.subr.mxu0 %v82_v37  ;;  %1668 = vmatprep.subr.mxu1 %v1836_v3 }
  0x90   :  { %v75_v38 = vpop.permute.xlu0 %74  ;;  %v65_v39 = vpop.permute.xlu1 %64 }
  0x91   :  { %v81_v40 = vsel %vm80_vm5, %v75_v38, %v77_v35 }
  0x92   :  { %166 = vmatpush1.msra.mxu0 %v81_v40 }
  0x94   :  { %v67_v41 = vpop.permute.xlu0 %66  ;;  %v63_v42 = vpop.permute.xlu1 %62 }
  0x95   :  { %1669 = vmatpush3.msra.mxu1 %v67_v41  ;;  %v70_v43 = vsel %vm68_vm6, %v65_v39, %v67_v41  ;;  %v69_v44 = vsel %vm68_vm6, %v63_v42, %v65_v39 }
  0x96   :  { %167 = vmatprep.subr.mxu0 %v70_v43  ;;  %1670 = vmatprep.subr.mxu1 %v1836_v3 }
  0x97   :  { %168 = vmatpush1.msra.mxu0 %v69_v44 }
  0x98   :  { %v53_v45 = vpop.permute.xlu0 %52  ;;  %v55_v46 = vpop.permute.xlu1 %54 }
  0x99   :  { %v58_v47 = vsel %vm56_vm7, %v53_v45, %v55_v46  ;;  %1671 = vmatpush3.msra.mxu1 %v55_v46 }
  0x9a   :  { %169 = vmatprep.subr.mxu0 %v58_v47  ;;  %1672 = vmatprep.subr.mxu1 %v1836_v3 }
  0x9c   :  { %v51_v48 = vpop.permute.xlu0 %50  ;;  %v41_v49 = vpop.permute.xlu1 %40 }
  0x9d   :  { %v57_v50 = vsel %vm56_vm7, %v51_v48, %v53_v45 }
  0x9e   :  { %170 = vmatpush1.msra.mxu0 %v57_v50 }
  0xa0   :  { %v43_v51 = vpop.permute.xlu0 %42  ;;  %v39_v52 = vpop.permute.xlu1 %38 }
  0xa1   :  { %1673 = vmatpush3.msra.mxu1 %v43_v51  ;;  %v46_v53 = vsel %vm44_vm8, %v41_v49, %v43_v51  ;;  %v45_v54 = vsel %vm44_vm8, %v39_v52, %v41_v49 }
  0xa2   :  { %171 = vmatprep.subr.mxu0 %v46_v53  ;;  %1674 = vmatprep.subr.mxu1 %v1836_v3 }
  0xa3   :  { %172 = vmatpush1.msra.mxu0 %v45_v54  ;;  %1675 = vmatpush3.msra.mxu1 %v1918_v2 }
  0xa4   :  { %173 = vmatprep.subr.mxu0 %v1904_v0  ;;  %1677 = vmatmul.mubr.msk.f32.vlgmr.msra.gmra.mxu1 %vm139_vm9, %v2017_v55  ;;  %v300_v56 = vpop.permute.xlu1 %299 }
  0xa5   :  { %174 = vmatpush1.msra.mxu0 %v1909_v1  ;;  %1684 = vmatprep.subr.mxu1 %v1836_v3 }
  0xa6   :  { %1468 = vmatmul.mubr.msk.f32.vlgmr.msra.gmra.mxu0 %vm139_vm9, %v2017_v55  ;;  %1702 = vmatprep.mubr.msk.f32.mxu1 %vm1842_vm0, %v1836_v3 }
  0xa8   :  { %v302_v59 = vpop.permute.xlu1 %301 }
  0xa9   :  { %v305_v8 = vsel %vm303_vm10, %v300_v56, %v302_v59 }
  0xad   :  { %v137_v57 = vpop.permute.xlu0 %136 }
  0xb1   :  { %v298_v0 = vpop.permute.xlu0 %297 }
  0xb2   :  { %v304_v9 = vsel %vm303_vm10, %v298_v0, %v300_v56 }
 0x164   :  { %v280_v58 = vpop.f32.mrf.mxu1 }
 0x165   :  { %v281_v60 = vadd.f32 %v280_v58, %v137_v57 }
 0x166   :  { %v209_v61 = vpop.f32.mrf.mxu0  ;;  %v1678_v62 = vpop.f32.mrf.mxu1 }
 0x167   :  { %v311_v63 = vmul.f32 %v302_v59, %v281_v60  ;;  %v210_v2 = vadd.f32 %v209_v61, %v137_v57  ;;  %v2136_v59 = vld [vmem:[%s2308_s1 + $0x20] sm:$0xff] }
 0x168   :  { %v211_v1 = vpop.f32.mrf.mxu0 }
 0x169   :  { %v2030_v4 = vmax.f32 %v311_v63, 0.0  ;;  %v212_v5 = vadd.f32 %v211_v1, %v137_v57  ;;  %v309_v14 = vmul.f32 %v304_v9, %v210_v2 }
 0x16b   :  { %v310_v13 = vmul.f32 %v305_v8, %v212_v5  ;;  %532 = vrot.lane.b32.xlu1 %v2030_v4, %s1837_s8  ;;  %543 = vrot.lane.b32.xlu0 %v2030_v4, %s1835_s28  ;;  %v2050_v15 = vmax.f32 %v309_v14, 0.0 }
 0x16d   :  { %345 = vmatprep.subr.mxu0 %v310_v13  ;;  %379 = vmatprep.mubr.f32.mxu0 %v310_v13  ;;  %v2070_v16 = vmax.f32 %v310_v13, 0.0 }
 0x16e   :  { %346 = vmatpush1.xpose.msra.mxu0 %v309_v14 }
 0x16f   :  { %510 = vrot.lane.b32.xlu1 %v2030_v4, %s1839_s9  ;;  %521 = vrot.lane.b32.xlu0 %v2030_v4, %s1838_s0 }
 0x170   :  { %1679 = vmatprep.subr.mxu0 %v1836_v3 }
 0x171   :  { %380 = vmatmul.mubr.f32.vlgmr.msra.gmra.mxu0 %v309_v14 }
 0x172   :  { %1680 = vmatpush3.xpose.msk.msra.mxu0 %vm128_vm1, %v311_v63  ;;  %1681 = vmatprep.mubr.msk.f32.mxu0 %vm1842_vm0, %v1836_v3 }
 0x173   :  { %488 = vrot.lane.b32.xlu1 %v2030_v4, %s1841_s11  ;;  %499 = vrot.lane.b32.xlu0 %v2030_v4, %s1840_s10 }
 0x175   :  { %1682 = vmatmul.mubr.msk.f32.vlgmr.msra.gmra.mxu0 %vm128_vm1, %v311_v63 }
 0x176   :  { %622 = vmatprep.mubr.f32.mxu0 %v1836_v3 }
 0x177   :  { %477 = vrot.lane.b32.xlu0 %v2030_v4, %s1843_s12  ;;  %539 = vrot.lane.b32.xlu1 %v2050_v15, %s1835_s28 }
 0x17b   :  { %528 = vrot.lane.b32.xlu0 %v2050_v15, %s1837_s8  ;;  %517 = vrot.lane.b32.xlu1 %v2050_v15, %s1838_s0 }
 0x17f   :  { %506 = vrot.lane.b32.xlu0 %v2050_v15, %s1839_s9  ;;  %495 = vrot.lane.b32.xlu1 %v2050_v15, %s1840_s10 }
 0x183   :  { %484 = vrot.lane.b32.xlu0 %v2050_v15, %s1841_s11  ;;  %473 = vrot.lane.b32.xlu1 %v2050_v15, %s1843_s12 }
 0x187   :  { %530 = vrot.lane.b32.xlu0 %v2070_v16, %s1837_s8  ;;  %541 = vrot.lane.b32.xlu1 %v2070_v16, %s1835_s28 }
 0x18b   :  { %508 = vrot.lane.b32.xlu0 %v2070_v16, %s1839_s9  ;;  %519 = vrot.lane.b32.xlu1 %v2070_v16, %s1838_s0 }
 0x18f   :  { %486 = vrot.lane.b32.xlu0 %v2070_v16, %s1841_s11  ;;  %497 = vrot.lane.b32.xlu1 %v2070_v16, %s1840_s10  ;;  %s1848_s11 = smov 116  }
 0x193   :  { %464 = vrot.lane.b32.xlu0 %v2070_v16, %s1845_s13  ;;  %475 = vrot.lane.b32.xlu1 %v2070_v16, %s1843_s12 }
 0x197   :  { %462 = vrot.lane.b32.xlu0 %v2050_v15, %s1845_s13  ;;  %466 = vrot.lane.b32.xlu1 %v2030_v4, %s1845_s13 }
 0x19b   :  { %552 = vperm.xlu1 %1788, %v2095_v17   ;;  %714 = vrot.lane.b32.xlu0 %v707_v19, %s1846_s18 }
 0x19f   :  { %716 = vrot.lane.b32.xlu1 %v711_v20, %s1846_s18  ;;  %712 = vrot.lane.b32.xlu0 %v703_v21, %s1846_s18  ;;  %v1576_v20 = vld [vmem:[%s2309_s2 + $0x90] sm:$0xff]  }
 0x1dd   :  { %v533_v22 = vpop.permute.xlu1 %532  ;;  %v544_v23 = vpop.permute.xlu0 %543 }
 0x1de   :  { %1685 = vmatpush3.msra.mxu1 %v544_v23 }
 0x1df   :  { %1686 = vmatprep.subr.mxu1 %v1836_v3 }
 0x1e0   :  { %1687 = vmatpush3.msra.mxu1 %v533_v22 }
 0x1e1   :  { %v511_v24 = vpop.permute.xlu1 %510  ;;  %1688 = vmatprep.subr.mxu1 %v1836_v3  ;;  %v522_v7 = vpop.permute.xlu0 %521 }
 0x1e2   :  { %1689 = vmatpush3.msra.mxu1 %v522_v7 }
 0x1e3   :  { %1690 = vmatprep.subr.mxu1 %v1836_v3 }
 0x1e4   :  { %1691 = vmatpush3.msra.mxu1 %v511_v24 }
 0x1e5   :  { %v489_v6 = vpop.permute.xlu1 %488  ;;  %1692 = vmatprep.subr.mxu1 %v1836_v3  ;;  %v500_v10 = vpop.permute.xlu0 %499 }
 0x1e6   :  { %1693 = vmatpush3.msra.mxu1 %v500_v10 }
 0x1e7   :  { %1694 = vmatprep.subr.mxu1 %v1836_v3 }
 0x1e8   :  { %1695 = vmatpush3.msra.mxu1 %v489_v6 }
 0x1e9   :  { %1696 = vmatprep.subr.mxu1 %v1836_v3  ;;  %v478_v11 = vpop.permute.xlu0 %477  ;;  %v540_v25 = vpop.permute.xlu1 %539 }
 0x1ea   :  { %1697 = vmatpush3.msra.mxu1 %v478_v11 }
 0x1eb   :  { %1698 = vmatprep.subr.mxu1 %v1836_v3 }
 0x1ed   :  { %v529_v26 = vpop.permute.xlu0 %528  ;;  %v518_v27 = vpop.permute.xlu1 %517 }
 0x1f1   :  { %v507_v28 = vpop.permute.xlu0 %506  ;;  %v496_v29 = vpop.permute.xlu1 %495 }
 0x1f5   :  { %v485_v30 = vpop.permute.xlu0 %484  ;;  %v474_v31 = vpop.permute.xlu1 %473 }
 0x1f9   :  { %v531_v32 = vpop.permute.xlu0 %530  ;;  %v542_v33 = vpop.permute.xlu1 %541 }
 0x1fa   :  { %v545_v34 = vsel %vm128_vm1, %v540_v25, %v542_v33  ;;  %v546_v35 = vsel %vm128_vm1, %v542_v33, %v544_v23  ;;  %v535_v36 = vsel %vm116_vm2, %v531_v32, %v533_v22  ;;  %v534_v37 = vsel %vm116_vm2, %v529_v26, %v531_v32  ;;  %v1573_v22 = vld [vmem:[%s2309_s2 + $0x78] sm:$0xff]   ;;  %v1311_v23 = vld [vmem:[%s2310_s3] sm:$0xff]  ;;  %v1312_v25 = vld [vmem:[%s2310_s3 + $0x8] sm:$0xff] }
 0x1fb   :  { %572 = vmatprep.subr.mxu0 %v546_v35  ;;  %v1557_v32 = vunpack.c.l.bf16 %v1576_v20 }
 0x1fc   :  { %573 = vmatpush1.msra.mxu0 %v545_v34 }
 0x1fd   :  { %v509_v38 = vpop.permute.xlu0 %508  ;;  %v520_v39 = vpop.permute.xlu1 %519  ;;  %574 = vmatprep.subr.mxu0 %v535_v36 }
 0x1fe   :  { %v523_v40 = vsel %vm104_vm3, %v518_v27, %v520_v39  ;;  %575 = vmatpush1.msra.mxu0 %v534_v37  ;;  %v524_v41 = vsel %vm104_vm3, %v520_v39, %v522_v7  ;;  %v513_v42 = vsel %vm92_vm4, %v509_v38, %v511_v24  ;;  %v512_v43 = vsel %vm92_vm4, %v507_v28, %v509_v38  ;;  %v1575_v28 = vld [vmem:[%s2309_s2 + $0x88] sm:$0xff]   ;;  %v1572_v37 = vld [vmem:[%s2309_s2 + $0x70] sm:$0xff]   ;;  %v1574_v38 = vld [vmem:[%s2309_s2 + $0x80] sm:$0xff]  }
 0x1ff   :  { %576 = vmatprep.subr.mxu0 %v524_v41  ;;  %v1546_v27 = vunpack.c.h.bf16 %v1573_v22  ;;  %v1554_v35 = vunpack.c.h.bf16 %v1575_v28  ;;  %v1545_v41 = vunpack.c.l.bf16 %v1573_v22 }
 0x200   :  { %577 = vmatpush1.msra.mxu0 %v523_v40 }
 0x201   :  { %v487_v44 = vpop.permute.xlu0 %486  ;;  %v498_v45 = vpop.permute.xlu1 %497  ;;  %578 = vmatprep.subr.mxu0 %v513_v42  ;;  %v1553_v42 = vunpack.c.l.bf16 %v1575_v28  ;;  %v1484_v28 = vld [vmem:[%s2309_s2] sm:$0xff]  }
 0x202   :  { %v501_v46 = vsel %vm80_vm5, %v496_v29, %v498_v45  ;;  %579 = vmatpush1.msra.mxu0 %v512_v43  ;;  %v502_v47 = vsel %vm80_vm5, %v498_v45, %v500_v10  ;;  %v491_v48 = vsel %vm68_vm6, %v487_v44, %v489_v6  ;;  %v490_v49 = vsel %vm68_vm6, %v485_v30, %v487_v44  ;;  %v1565_v29 = vld [vmem:[%s2309_s2 + $0x38] sm:$0xff]   ;;  %v1564_v43 = vld [vmem:[%s2309_s2 + $0x30] sm:$0xff]  }
 0x203   :  { %580 = vmatprep.subr.mxu0 %v502_v47  ;;  %v1514_v36 = vunpack.c.h.bf16 %v1565_v29  ;;  %v1513_v45 = vunpack.c.l.bf16 %v1565_v29  ;;  %v1542_v47 = vunpack.c.h.bf16 %v1572_v37 }
 0x204   :  { %581 = vmatpush1.msra.mxu0 %v501_v46 }
 0x205   :  { %v465_v50 = vpop.permute.xlu0 %464  ;;  %v476_v51 = vpop.permute.xlu1 %475  ;;  %582 = vmatprep.subr.mxu0 %v491_v48  ;;  %v1550_v48 = vunpack.c.h.bf16 %v1574_v38 }
 0x206   :  { %v479_v52 = vsel %vm56_vm7, %v474_v31, %v476_v51  ;;  %583 = vmatpush1.msra.mxu0 %v490_v49  ;;  %v480_v53 = vsel %vm56_vm7, %v476_v51, %v478_v11  ;;  %v1558_v11 = vunpack.c.h.bf16 %v1576_v20  ;;  %v1510_v49 = vunpack.c.h.bf16 %v1564_v43 }
 0x207   :  { %584 = vmatprep.subr.mxu0 %v480_v53  ;;  %v1549_v53 = vunpack.c.l.bf16 %v1574_v38 }
 0x208   :  { %585 = vmatpush1.msra.mxu0 %v479_v52  ;;  %v1541_v52 = vunpack.c.l.bf16 %v1572_v37 }
 0x209   :  { %v463_v54 = vpop.permute.xlu0 %462  ;;  %v467_v56 = vpop.permute.xlu1 %466 }
 0x20a   :  { %v468_v57 = vsel %vm44_vm8, %v463_v54, %v465_v50  ;;  %1699 = vmatpush3.msra.mxu1 %v467_v56  ;;  %v469_v58 = vsel %vm44_vm8, %v465_v50, %v467_v56  ;;  %v1571_v50 = vld [vmem:[%s2309_s2 + $0x68] sm:$0xff]   ;;  %v1509_v56 = vunpack.c.l.bf16 %v1564_v43 }
 0x20b   :  { %586 = vmatprep.subr.mxu0 %v469_v58  ;;  %1700 = vmatprep.subr.mxu1 %v1836_v3  ;;  %v1563_v54 = vld [vmem:[%s2309_s2 + $0x28] sm:$0xff]  }
 0x20c   :  { %587 = vmatpush1.msra.mxu0 %v468_v57  ;;  %1701 = vmatpush3.msra.mxu1 %v2030_v4  ;;  %v1538_v57 = vunpack.c.h.bf16 %v1571_v50 }
 0x20d   :  { %588 = vmatprep.subr.mxu0 %v2070_v16  ;;  %1703 = vmatmul.mubr.msk.f32.vlgmr.msra.gmra.mxu1 %vm139_vm9, %v2136_v59  ;;  %v715_v2 = vpop.permute.xlu0 %714  ;;  %v2155_v16 = vld [vmem:[%s2310_s3 + $0x10] sm:$0xff] }
 0x20e   :  { %589 = vmatpush1.msra.mxu0 %v2050_v15  ;;  %1705 = vmatprep.subr.mxu1 %v1836_v3 }
 0x20f   :  { %1472 = vmatmul.mubr.msk.f32.vlgmr.msra.gmra.mxu0 %vm139_vm9, %v2136_v59  ;;  %1707 = vmatprep.mubr.msk.f32.mxu1 %vm1842_vm0, %v1836_v3 }
 0x211   :  { %v713_v4 = vpop.permute.xlu0 %712 }
 0x212   :  { %v718_v13 = vsel %vm303_vm10, %v713_v4, %v715_v2  ;;  %v1569_v4 = vld [vmem:[%s2309_s2 + $0x58] sm:$0xff]  }
 0x216   :  { %v553_v1 = vpop.permute.xlu1 %552 }
 0x21a   :  { %v717_v8 = vpop.permute.xlu1 %716 }
 0x21b   :  { %v719_v10 = vsel %vm303_vm10, %v715_v2, %v717_v8  ;;  %v1505_v2 = vunpack.c.l.bf16 %v1563_v54 }
 0x231   :  { %v381_v60 = vpop.f32.mrf.mxu0 }
 0x233   :  { %v383_v61 = vpop.f32.mrf.mxu0 }
 0x234   :  { %v1570_v61 = vld [vmem:[%s2309_s2 + $0x60] sm:$0xff]  }
 0x235   :  { %v451_v62 = vpop.f32.mrf.mxu0 }
 0x236   :  { %v2149_v63 = vadd.f32 %v451_v62, %v381_v60  ;;  %v1506_v60 = vunpack.c.h.bf16 %v1563_v54  ;;  %v1537_v62 = vunpack.c.l.bf16 %v1571_v50 }
 0x237   :  { %v1683_v0 = vpop.f32.mrf.mxu0 }
 0x238   :  { %v1562_v0 = vld [vmem:[%s2309_s2 + $0x20] sm:$0xff]  }
 0x2cd   :  { %v695_v5 = vpop.f32.mrf.mxu1 }
 0x2ce   :  { %v696_v9 = vadd.f32 %v695_v5, %v553_v1  ;;  %v1533_v5 = vunpack.c.l.bf16 %v1570_v61 }
 0x2cf   :  { %v624_v14 = vpop.f32.mrf.mxu0  ;;  %v1704_v15 = vpop.f32.mrf.mxu1 }
 0x2d0   :  { %v2157_v18 = vmul.f32 %v717_v8, %v696_v9  ;;  %v625_v19 = vadd.f32 %v624_v14, %v553_v1  ;;  %v1561_v8 = vld [vmem:[%s2309_s2 + $0x18] sm:$0xff]   ;;  %v1501_v9 = vunpack.c.l.bf16 %v1562_v0  ;;  %v1568_v15 = vld [vmem:[%s2309_s2 + $0x50] sm:$0xff]  }
 0x2d1   :  { %v626_v21 = vpop.f32.mrf.mxu0  ;;  %v1498_v14 = vunpack.c.h.bf16 %v1561_v8  ;;  %v1497_v20 = vunpack.c.l.bf16 %v1561_v8 }
 0x2d2   :  { %v2168_v24 = vmul.f32 %v718_v13, %v625_v19  ;;  %v627_v7 = vadd.f32 %v626_v21, %v553_v1  ;;  %1706 = vmatpush3.xpose.msk.msra.mxu1 %vm728_vm11, %v2157_v18  ;;  %729 = vst.msk [vmem:[#allocation2 + $0x10] sm:$0xff] %vm728_vm11, %v2157_v18  ;;  %v1333_v6 = vsub.f32 %v2155_v16, %v2157_v18  ;;  %v876_v58 = vmax.f32 %v2157_v18, 0.0  ;;  %v1560_v19 = vld [vmem:[%s2309_s2 + $0x10] sm:$0xff]  }
 0x2d3   :  { %1710 = vmatprep.subr.mxu1 %v1836_v3  ;;  %v1502_v1 = vunpack.c.h.bf16 %v1562_v0  ;;  %v1530_v13 = vunpack.c.h.bf16 %v1569_v4  ;;  %v1526_v21 = vunpack.c.h.bf16 %v1568_v15  ;;  %v1494_v22 = vunpack.c.h.bf16 %v1560_v19 }
 0x2d4   :  { %726 = vst [vmem:[#allocation2] sm:$0xff] %v2168_v24  ;;  %v724_v26 = vmul.f32 %v719_v10, %v627_v7  ;;  %v1336_v30 = vmul.f32 %v1333_v6, %v1333_v6  ;;  %v1331_v31 = vsub.f32 %v1311_v23, %v2168_v24  ;;  %v1567_v23 = vld [vmem:[%s2309_s2 + $0x48] sm:$0xff]   ;;  %v1525_v7 = vunpack.c.l.bf16 %v1568_v15 }
 0x2d5   :  { %1708 = vmatmul.mubr.msk.f32.vlgmr.msra.gmra.mxu1 %vm728_vm11, %v2157_v18  ;;  %v1529_v18 = vunpack.c.l.bf16 %v1569_v4  ;;  %v1559_v6 = vld [vmem:[%s2309_s2 + $0x8] sm:$0xff]   ;;  %v1493_v10 = vunpack.c.l.bf16 %v1560_v19 }
 0x2d6   :  { %727 = vst [vmem:[#allocation2 + $0x8] sm:$0xff] %v724_v26  ;;  %763 = vmatprep.subr.mxu0 %v724_v26  ;;  %797 = vmatprep.mubr.f32.mxu0 %v724_v26  ;;  %v1332_v33 = vsub.f32 %v1312_v25, %v724_v26  ;;  %v1338_v34 = vsel %vm728_vm11, %v1336_v30, 0.0  ;;  %v1334_v39 = vmul.f32 %v1331_v31, %v1331_v31  ;;  %v875_v44 = vmax.f32 %v724_v26, 0.0  ;;  %v1566_v26 = vld [vmem:[%s2309_s2 + $0x40] sm:$0xff]   ;;  %s1847_s2 = smov 106  }
 0x2d7   :  { %1711 = vmatpush3.msra.mxu1 %v1558_v11  ;;  %764 = vmatpush1.xpose.msra.mxu0 %v2168_v24  ;;  %v1522_v11 = vunpack.c.h.bf16 %v1567_v23  ;;  %v1490_v25 = vunpack.c.h.bf16 %v1559_v6  ;;  %v1489_v29 = vunpack.c.l.bf16 %v1559_v6  ;;  %v1518_v30 = vunpack.c.h.bf16 %v1566_v26  ;;  %v1314_v6 = vld [vmem:[%s2310_s3 + $0x18] sm:$0xff] }
 0x2d8   :  { %1712 = vmatprep.subr.mxu1 %v1836_v3  ;;  %1601 = vmatprep.subr.mxu0 %v1546_v27  ;;  %v1335_v40 = vmul.f32 %v1332_v33, %v1332_v33  ;;  %v1521_v27 = vunpack.c.l.bf16 %v1567_v23  ;;  %v1486_v31 = vunpack.c.h.bf16 %v1484_v28  ;;  %v1485_v33 = vunpack.c.l.bf16 %v1484_v28 }
 0x2d9   :  { %1713 = vmatpush3.msra.mxu1 %v1557_v32  ;;  %1722 = vmatprep.mubr.msk.f32.mxu1 %vm1842_vm0, %v1836_v3  ;;  %v1517_v32 = vunpack.c.l.bf16 %v1566_v26  ;;  %v455_v26 = vmul.f32 0.00048828125, %v2149_v63 }
 0x2da   :  { %1714 = vmatprep.subr.mxu1 %v1836_v3  ;;  %798 = vmatmul.mubr.f32.vlgmr.msra.gmra.mxu0 %v2168_v24  ;;  %v1337_v46 = vadd.f32 %v1335_v40, %v1334_v39 }
 0x2db   :  { %1715 = vmatpush3.msra.mxu1 %v1554_v35  ;;  %1602 = vmatpush3.msra.mxu0 %v1514_v36 }
 0x2dc   :  { %1020 = vmatprep.mubr.f32.mxu0 %v875_v44  ;;  %1716 = vmatprep.subr.mxu1 %v1836_v3  ;;  %v2211_v51 = vadd.f32 %v1338_v34, %v1337_v46  ;;  %v874_v34 = vmax.f32 %v2168_v24, 0.0  ;;  %v1851_v24 = vmov 17   ;;  %v31_v46 = vld [vmem:[%s2308_s1 + $0xa] ss:$0 sm:$0xff] }
 0x2dd   :  { %1603 = vmatprep.subr.mxu0 %v1545_v41  ;;  %1717 = vmatpush3.msra.mxu1 %v1553_v42 }
 0x2de   :  { %1604 = vmatpush3.msra.mxu0 %v1513_v45  ;;  %1718 = vmatprep.subr.mxu1 %v1836_v3 }
 0x2df   :  { %1605 = vmatprep.subr.mxu0 %v1542_v47  ;;  %1719 = vmatpush3.msra.mxu1 %v1550_v48 }
 0x2e0   :  { %1606 = vmatpush3.msra.mxu0 %v1510_v49  ;;  %1720 = vmatprep.subr.mxu1 %v1836_v3  ;;  %v1534_v3 = vunpack.c.h.bf16 %v1570_v61 }
 0x2e1   :  { %1607 = vmatprep.subr.mxu0 %v1541_v52  ;;  %1721 = vmatpush3.msra.mxu1 %v1549_v53 }
 0x2e2   :  { %1608 = vmatpush3.msra.mxu0 %v1509_v56  ;;  %1723 = vmatmul.mubr.msk.f32.vlgmr.msra.gmra.mxu1 %vm728_vm11, %v876_v58 }
 0x2e3   :  { %1609 = vmatprep.subr.mxu0 %v1538_v57  ;;  %1789 = vset.pattern.permute.xlu1 %v1851_v24 }
 0x2e4   :  { %1610 = vmatpush3.msra.mxu0 %v1506_v60  ;;  %1790 = vset.pattern.permute.xlu0 %v1851_v24 }
 0x2e5   :  { %1611 = vmatprep.subr.mxu0 %v1537_v62 }
 0x2e6   :  { %1612 = vmatpush3.msra.mxu0 %v1505_v2 }
 0x2e7   :  { %1613 = vmatprep.subr.mxu0 %v1534_v3 }
 0x2e8   :  { %1614 = vmatpush3.msra.mxu0 %v1502_v1 }
 0x2e9   :  { %1615 = vmatprep.subr.mxu0 %v1533_v5 }
 0x2ea   :  { %1616 = vmatpush3.msra.mxu0 %v1501_v9 }
 0x2eb   :  { %1617 = vmatprep.subr.mxu0 %v1530_v13 }
 0x2ec   :  { %1618 = vmatpush3.msra.mxu0 %v1498_v14 }
 0x2ed   :  { %1619 = vmatprep.subr.mxu0 %v1529_v18  ;;  %v1315_v18 = vld [vmem:[%s2310_s3 + $0x28] sm:$0xff]  ;;  %s1857_s3 = smov 16  }
 0x2ee   :  { %1620 = vmatpush3.msra.mxu0 %v1497_v20 }
 0x2ef   :  { %1621 = vmatprep.subr.mxu0 %v1526_v21 }
 0x2f0   :  { %1622 = vmatpush3.msra.mxu0 %v1494_v22 }
 0x2f1   :  { %1623 = vmatprep.subr.mxu0 %v1525_v7 }
 0x2f2   :  { %1624 = vmatpush3.msra.mxu0 %v1493_v10 }
 0x2f3   :  { %1625 = vmatprep.subr.mxu0 %v1522_v11 }
 0x2f4   :  { %1626 = vmatpush3.msra.mxu0 %v1490_v25 }
 0x2f5   :  { %1627 = vmatprep.subr.mxu0 %v1521_v27  ;;  %v1316_v27 = vsub.f32 %v1314_v6, %v455_v26 }
 0x2f6   :  { %1628 = vmatpush3.msra.mxu0 %v1489_v29 }
 0x2f7   :  { %1629 = vmatprep.subr.mxu0 %v1518_v30  ;;  %v1317_v28 = vmul.f32 %v1316_v27, %v1316_v27 }
 0x2f8   :  { %1630 = vmatpush3.msra.mxu0 %v1486_v31 }
 0x2f9   :  { %1631 = vmatprep.subr.mxu0 %v1517_v32 }
 0x2fa   :  { %1632 = vmatpush3.msra.mxu0 %v1485_v33 }
 0x2fb   :  { %1021 = vmatmul.mubr.f32.vlgmr.msra.gmra.mxu0 %v874_v34 }
 0x395   :  { %v869_v35 = vpop.f32.mrf.mxu1 }
 0x397   :  { %v1709_v36 = vpop.f32.mrf.mxu1 }
 0x39a   :  { %v799_v37 = vpop.f32.mrf.mxu0 }
 0x39b   :  { %v2251_v38 = vadd.f32 %v869_v35, %v799_v37 }
 0x39c   :  { %v801_v39 = vpop.f32.mrf.mxu0 }
 0x39d   :  { %v873_v15 = vmul.f32 0.00048828125, %v2251_v38 }
 0x3a2   :  { %v1092_v40 = vpop.f32.mrf.mxu1 }
 0x3a4   :  { %v1724_v41 = vpop.f32.mrf.mxu1 }
 0x3bb   :  { %v1633_v42 = vpop.f32.mrf.mxu0 }
 0x3bd   :  { %v1634_v43 = vpop.f32.mrf.mxu0 }
 0x3be   :  { %v1635_v44 = vadd.f32 %v1634_v43, %v1633_v42 }
 0x3c0   :  { %v1093_v45 = vadd.f32 %v1635_v44, %v1092_v40 }
 0x3c2   :  { %1115 = vrot.lane.b32.xlu0 %v1093_v45, %s1839_s9  ;;  %1118 = vrot.lane.b32.xlu1 %v1093_v45, %s1847_s2 }
 0x3c6   :  { %1109 = vrot.lane.b32.xlu0 %v1093_v45, %s1848_s11  ;;  %1112 = vrot.lane.b32.xlu1 %v1093_v45, %s1840_s10 }
 0x3ca   :  { %1103 = vrot.lane.b32.xlu0 %v1093_v45, %s1849_s14  ;;  %1106 = vrot.lane.b32.xlu1 %v1093_v45, %s1850_s15 }
 0x3ce   :  { %1131 = vrot.lane.b32.xlu0 %v1981_v12, %s1852_s16  ;;  %1100 = vrot.lane.b32.xlu1 %v1093_v45, %s1843_s12 }
 0x3d2   :  { %1097 = vrot.lane.b32.xlu0 %v1093_v45, %s1845_s13  ;;  %1129 = vrot.lane.b32.xlu1 %v2017_v55, %s1852_s16 }
 0x3d6   :  { %1135 = vrot.lane.b32.xlu0 %v2095_v17, %s1852_s16  ;;  %1133 = vrot.lane.b32.xlu1 %v2136_v59, %s1852_s16 }
 0x3da   :  { %1126 = vperm.xlu1 %1789, %v2095_v17   ;;  %1122 = vperm.xlu0 %1790, %v1981_v12  }
 0x3de   :  { %1220 = vrot.lane.b32.xlu1 %v31_v46, %s1846_s18 }
 0x434   :  { %v1116_v47 = vpop.permute.xlu0 %1115  ;;  %v1119_v48 = vpop.permute.xlu1 %1118 }
 0x435   :  { %1725 = vmatprep.subr.mxu1 %v1119_v48 }
 0x436   :  { %1726 = vmatpush3.msra.mxu1 %v1119_v48 }
 0x437   :  { %1727 = vmatprep.subr.mxu1 %v1116_v47 }
 0x438   :  { %v1110_v55 = vpop.permute.xlu0 %1109  ;;  %1728 = vmatpush3.msra.mxu1 %v1116_v47  ;;  %v1113_v49 = vpop.permute.xlu1 %1112 }
 0x439   :  { %1729 = vmatprep.subr.mxu1 %v1113_v49 }
 0x43a   :  { %1730 = vmatpush3.msra.mxu1 %v1113_v49 }
 0x43b   :  { %1731 = vmatprep.subr.mxu1 %v1110_v55 }
 0x43c   :  { %v1104_v17 = vpop.permute.xlu0 %1103  ;;  %1732 = vmatpush3.msra.mxu1 %v1110_v55  ;;  %v1107_v12 = vpop.permute.xlu1 %1106 }
 0x43d   :  { %1733 = vmatprep.subr.mxu1 %v1107_v12 }
 0x43e   :  { %1734 = vmatpush3.msra.mxu1 %v1107_v12 }
 0x43f   :  { %1735 = vmatprep.subr.mxu1 %v1104_v17 }
 0x440   :  { %v1132_v59 = vpop.permute.xlu0 %1131  ;;  %1736 = vmatpush3.msra.mxu1 %v1104_v17  ;;  %v1101_v50 = vpop.permute.xlu1 %1100 }
 0x441   :  { %1737 = vmatprep.subr.mxu1 %v1101_v50 }
 0x442   :  { %1738 = vmatpush3.msra.mxu1 %v1101_v50 }
 0x444   :  { %v1098_v52 = vpop.permute.xlu0 %1097  ;;  %v1130_v53 = vpop.permute.xlu1 %1129 }
 0x445   :  { %v1138_v54 = vsel %vm1137_vm12, %v1130_v53, %v1132_v59  ;;  %1739 = vmatprep.subr.mxu1 %v1098_v52 }
 0x446   :  { %1740 = vmatpush3.msra.mxu1 %v1098_v52  ;;  %1743 = vmatprep.mubr.msk.f32.mxu1 %vm139_vm9, %v1138_v54 }
 0x447   :  { %1741 = vmatprep.subr.mxu1 %v1093_v45 }
 0x448   :  { %v1136_v56 = vpop.permute.xlu0 %1135  ;;  %1742 = vmatpush3.msra.mxu1 %v1093_v45  ;;  %v1134_v57 = vpop.permute.xlu1 %1133 }
 0x449   :  { %v1139_v58 = vsel %vm1137_vm12, %v1134_v57, %v1136_v56 }
 0x44a   :  { %1744 = vmatmul.mubr.msk.f32.vlgmr.msra.gmra.mxu1 %vm139_vm9, %v1139_v58 }
 0x455   :  { %v1127_v60 = vpop.permute.xlu1 %1126  ;;  %v1123_v61 = vpop.permute.xlu0 %1122 }
 0x459   :  { %v1221_v0 = vpop.permute.xlu1 %1220 }
 0x50a   :  { %v1745_v62 = vpop.f32.mrf.mxu1 }
 0x50b   :  { %v1216_v2 = vadd.f32 %v1745_v62, %v1127_v60 }
 0x50c   :  { %v1210_v3 = vpop.f32.mrf.mxu1 }
 0x50d   :  { %v1211_v1 = vadd.f32 %v1210_v3, %v1123_v61  ;;  %v1224_v4 = vmul.f32 %v1221_v0, %v1216_v2 }
 0x50f   :  { %v1223_v5 = vmul.f32 %v1221_v0, %v1211_v1  ;;  %1227 = vst.msk [vmem:[%s2311_s4 + $0x8] sm:$0xff] %vm1225_vm13, %v1224_v4  ;;  %1746 = vmatprep.subr.msk.mxu1 %vm1225_vm13, %v1224_v4 }
 0x510   :  { %1747 = vmatpush3.xpose.msk.msra.mxu1 %vm1225_vm13, %v1224_v4 }
 0x511   :  { %1226 = vst.msk [vmem:[%s2311_s4] sm:$0xff] %vm1225_vm13, %v1223_v5  ;;  %1748 = vmatprep.subr.msk.mxu1 %vm1225_vm13, %v1223_v5  ;;  %1750 = vmatprep.mubr.msk.f32.mxu1 %vm1225_vm13, %v1223_v5  ;;  %s1855_s4 = smov 80  }
 0x514   :  { %1749 = vmatpush3.xpose.msk.msra.mxu1 %vm1225_vm13, %v1223_v5 }
 0x517   :  { %1751 = vmatmul.mubr.msk.f32.vlgmr.msra.gmra.mxu1 %vm1225_vm13, %v1224_v4 }
 0x5d7   :  { %v1752_v8 = vpop.f32.mrf.mxu1 }
 0x5d8   :  { %v1310_v9 = vmul.f32 0.0009765625, %v1752_v8 }
 0x5d9   :  { %v1300_v13 = vpop.f32.mrf.mxu1 }
 0x5da   :  { %v1309_v14 = vmul.f32 0.0009765625, %v1300_v13  ;;  %1377 = vrot.lane.b32.xlu0 %v1310_v9, %s1853_s17 }
 0x5dc   :  { %1375 = vrot.lane.b32.xlu1 %v1309_v14, %s1853_s17 }
 0x5e0   :  { %1352 = vrot.lane.b32.xlu1 %v873_v15, %s1854_s19 }
 0x64c   :  { %v1378_v19 = vpop.permute.xlu0 %1377 }
 0x64d   :  { %v1382_v20 = vsub.f32 %v1315_v18, %v1378_v19 }
 0x64e   :  { %v1376_v21 = vpop.permute.xlu1 %1375 }
 0x64f   :  { %v1384_v22 = vmul.f32 %v1382_v20, %v1382_v20  ;;  %v1381_v23 = vsub.f32 %v2155_v16, %v1376_v21  ;;  %v1319_v16 = vsel %vm1318_vm14, %v1317_v28, 0.0 }
 0x651   :  { %v1383_v7 = vmul.f32 %v1381_v23, %v1381_v23  ;;  %1389 = vrot.lane.b32.xlu1 %v1384_v22, %s1855_s4 }
 0x652   :  { %v2284_v10 = vpop.permute.xlu1 %1352 }
 0x653   :  { %v1355_v11 = vsub.f32 %v1314_v6, %v2284_v10  ;;  %1387 = vrot.lane.b32.xlu0 %v1383_v7, %s1855_s4 }
 0x655   :  { %v1356_v25 = vmul.f32 %v1355_v11, %v1355_v11 }
 0x657   :  { %1358 = vrot.lane.b32.xlu0 %v1356_v25, %s1856_s24 }
 0x675   :  { %1320 = vadd.xlane.f32.xlu1 %v1319_v16 }
 0x676   :  { %1340 = vadd.xlane.f32.xlu0 %v2211_v51 }
 0x6c3   :  { %v1390_v29 = vpop.permute.xlu1 %1389 }
 0x6c4   :  { %v1395_v31 = vsel %vm1393_vm15, %v1390_v29, 0.0 }
 0x6c5   :  { %v1388_v30 = vpop.permute.xlu0 %1387 }
 0x6c6   :  { %v1394_v32 = vsel %vm1393_vm15, %v1388_v30, 0.0 }
 0x6c7   :  { %v1396_v33 = vadd.f32 %v1395_v31, %v1394_v32 }
 0x6c9   :  { %v1359_v34 = vpop.permute.xlu0 %1358  ;;  %1397 = vadd.xlane.f32.xlu1 %v1396_v33 }
 0x6ca   :  { %v1361_v63 = vsel %vm1318_vm14, %v1359_v34, 0.0 }
 0x6cb   :  { %1362 = vadd.xlane.f32.xlu0 %v1361_v63 }
 0x6da   :  { %1419 = vrot.lane.b32.xlu1 %v1310_v9, %s1857_s3 }
 0x6e1   :  { %1417 = vrot.lane.b32.xlu0 %v1309_v14, %s1857_s3 }
 0x6fe   :  { %v1321_v35 = vpop.xlane.xlu1 %1320 }
 0x6ff   :  { %v1322_v36 = vrot.slane %v1321_v35, 4  ;;  %v1341_v37 = vpop.xlane.xlu0 %1340 }
 0x700   :  { %v1342_v51 = vrot.slane %v1341_v37, 4 }
 0x701   :  { %v1323_v38 = vadd.f32 %v1322_v36, %v1321_v35 }
 0x702   :  { %v1343_v39 = vadd.f32 %v1342_v51, %v1341_v37 }
 0x703   :  { %v1324_v40 = vrot.slane %v1323_v38, 2 }
 0x704   :  { %v1344_v41 = vrot.slane %v1343_v39, 2 }
 0x705   :  { %v1325_v42 = vadd.f32 %v1324_v40, %v1323_v38 }
 0x706   :  { %v1345_v43 = vadd.f32 %v1344_v41, %v1343_v39 }
 0x707   :  { %v1326_v44 = vrot.slane %v1325_v42, 1 }
 0x708   :  { %v1346_v45 = vrot.slane %v1345_v43, 1 }
 0x709   :  { %v1327_v24 = vadd.f32 %v1326_v44, %v1325_v42 }
 0x70a   :  { %v1347_v46 = vadd.f32 %v1346_v45, %v1345_v43 }
 0x70b   :  { %1753 = vpush %v1327_v24 }
 0x70c   :  { %1755 = vpush %v1347_v46 }
 0x70d   :  { %1802 = shalt.err (!%p1799_p4)
}
 0x70e   :  { %1439 = dma.vmem_to_hbm [thread:$0]  %s1437_s26, 384, %s2312_s5, [#allocation3]   ;;  %vm1425_vm0 = vcmask 261120   ;;  %v1416_v53 = vsel %vm1318_vm14, %v455_v26, %v2284_v10 }
 0x70f   :  { %s1859_s30 = smov [#allocation4]  }
 0x710   :  { %s1445_s8 = sshll.u32 %s1859_s30, 4  ;;  %s1446_s8 = int_to_ptr.vmem [resolvable:$true] %s1445_s8 }
 0x711   :  { %s1811_s5 = scalar_lea.vmem %s1446_s8, 256  ;;  %p1816_p6 = scmp.lt.s32.totalorder %s1446_s8, %s1446_s8 }
 0x712   :  { %p1812_p5 = scmp.ne.s32.totalorder %s1446_s8, %s1811_s5  ;;  %p1817_p7 = scmp.lt.s32.totalorder %s1811_s5, %s1811_s5 }
 0x714   :  { %p1818_p8 = por %p1817_p7, %p1816_p6 }
 0x716   :  { %p1819_p9 = pnand %p1818_p8, %p1812_p5 }
 0x752   :  { %v1398_v47 = vpop.xlane.xlu1 %1397 }
 0x753   :  { %v1399_v48 = vrot.slane %v1398_v47, 4 }
 0x754   :  { %v1363_v55 = vpop.xlane.xlu0 %1362 }
 0x755   :  { %v1400_v49 = vadd.f32 %v1399_v48, %v1398_v47  ;;  %v1364_v17 = vrot.slane %v1363_v55, 4 }
 0x756   :  { %v1420_v12 = vpop.permute.xlu1 %1419 }
 0x757   :  { %v1401_v59 = vrot.slane %v1400_v49, 2  ;;  %v1365_v50 = vadd.f32 %v1364_v17, %v1363_v55  ;;  %v1424_v52 = vsel %vm1393_vm15, 0.0, %v1420_v12 }
 0x758   :  { %1427 = vst.msk [vmem:[#allocation4 + $0x8] sm:$0xff] %vm1425_vm0, %v1424_v52  ;;  %v1418_v54 = vpop.permute.xlu0 %1417 }
 0x759   :  { %v1366_v56 = vrot.slane %v1365_v50, 2  ;;  %v1423_v57 = vsel %vm1393_vm15, %v1416_v53, %v1418_v54  ;;  %v1402_v58 = vadd.f32 %v1401_v59, %v1400_v49 }
 0x75a   :  { %1426 = vst.msk [vmem:[#allocation4] sm:$0xff] %vm1425_vm0, %v1423_v57 }
 0x75b   :  { %v1367_v60 = vadd.f32 %v1366_v56, %v1365_v50 }
 0x75c   :  { %1822 = shalt.err (!%p1819_p9)
}
 0x75d   :  { %s1860_s0 = smov 128   ;;  %v1403_v61 = vrot.slane %v1402_v58, 1  ;;  %v1368_v62 = vrot.slane %v1367_v60, 1  ;;  %s1754_s14 = spop %1753  ;;  %vm1408_vm1 = vcmask 7168   ;;  %vm1410_vm2 = vcmask 15360  }
 0x75e   :  { %1451 = dma.vmem_to_hbm [thread:$0]  %s1446_s8, 256, %s2313_s6, [#allocation5], %s1860_s0, %s1860_s0, %s1854_s19   ;;  %vm1412_vm3 = vcmask 23552   ;;  %vm1414_vm4 = vcmask 24576  }
 0x75f   :  { %v1369_v0 = vadd.f32 %v1368_v62, %v1367_v60  ;;  %v1404_v2 = vadd.f32 %v1403_v61, %v1402_v58  ;;  %s1756_s15 = spop %1755  ;;  %v1329_v3 = vstv %s1754_s14 }
 0x760   :  { %v1349_v1 = vstv %s1756_s15  ;;  %v1330_v4 = vmul.f32 0.015625, %v1329_v3 }
 0x761   :  { %1757 = vpush %v1369_v0  ;;  %v1350_v5 = vmul.f32 0.00048828125, %v1349_v1 }
 0x762   :  { %1759 = vpush %v1404_v2 }
 0x763   :  { %v1409_v14 = vsel %vm1408_vm1, %v1330_v4, %v1350_v5 }
 0x792   :  { %s1758_s16 = spop %1757 }
 0x793   :  { %v1371_v8 = vstv %s1758_s16  ;;  %s1760_s9 = spop %1759 }
 0x794   :  { %v1372_v9 = vmul.f32 0.015625, %v1371_v8  ;;  %v1406_v13 = vstv %s1760_s9 }
 0x795   :  { %v1407_v15 = vmul.f32 0.00390625, %v1406_v13 }
 0x796   :  { %v1411_v18 = vsel %vm1410_vm2, %v1409_v14, %v1372_v9 }
 0x797   :  { %v1413_v19 = vsel %vm1412_vm3, %v1411_v18, %v1407_v15 }
 0x798   :  { %1415 = vst.msk [vmem:[%s2314_s7] sm:$0x1] %vm1414_vm4, %v1413_v19 }
 0x799   :  { %1831 = dma.done.wait [#allocation3], 384  }
 0x79a   :  { %1832 = vsyncadd [#allocation3], 4294966912 }
 0x79b   :  { %1833 = dma.done.wait [#allocation5], 256  }
 0x79c   :  { %1834 = vsyncadd [#allocation5], 4294967040 }
 0x79d   :  { %1464 = vsyncpa [#allocation3], 1 }
 0x79e   :  { %1465 = vsyncpa [#allocation5], 1 }

</bundles_post_ra>
